<compile_context>
chip_gen: v5e
topology: v5e:2x2
jax: 0.10.0
libtpu: 0.0.40
codegen_flags: <defaults>
</compile_context>

<pallas_src>
import jax
import jax.numpy as jnp
from jax import lax
from jax.experimental import pallas as pl
from jax.experimental.pallas import tpu as pltpu


def _arm_kernel(p_ref, w_ref, b_ref, loc_ref, conf_ref):
    # p_ref:    (1, K, M)   im2col patches (transposed), one batch element
    # w_ref:    (Ct, K)     fused [loc; conf] conv weights, K = 9*Cin
    # b_ref:    (Ct, 1)     fused bias
    # loc_ref:  (1, Cl, M)  M = H*W on the lane axis (dense stores)
    # conf_ref: (1, Cc, M)
    cl = loc_ref.shape[1]
    # Single MXU matmul: (Ct, K) @ (K, M) -> (Ct, M), f32 accumulation.
    acc = jnp.dot(w_ref[...], p_ref[0], preferred_element_type=jnp.float32)
    acc = acc + b_ref[...]  # lane-broadcast bias, added once
    # Split the fused head along sublanes (cl=24 is 8-aligned).
    loc_ref[0] = acc[:cl].astype(loc_ref.dtype)
    conf_ref[0] = acc[cl:].astype(conf_ref.dtype)


@jax.jit
def anchor_refinement_module(x_nchw, w_loc, b_loc, w_conf, b_conf):
    """Pallas ARM forward.

    Args:
      x_nchw: (N, Cin, H, W) float32 input (PyTorch NCHW convention).
      w_loc:  (Cl, Cin, 3, 3) loc conv weight (PyTorch OIHW convention).
      b_loc:  (Cl,) loc conv bias.
      w_conf: (Cc, Cin, 3, 3) conf conv weight.
      b_conf: (Cc,) conf conv bias.

    Returns:
      (loc, conf) both NCHW: (N, Cl, H, W), (N, Cc, H, W).
    """
    N, Cin, H, W = x_nchw.shape
    Cl = w_loc.shape[0]
    Cc = w_conf.shape[0]
    Ct = Cl + Cc
    K = 9 * Cin
    M = H * W

    # im2col (transposed): patches[n, cin*9 + dy*3 + dx, y*W + x]
    #   = x_pad[n, cin, y+dy, x+dx], matching the OIHW weight flatten below.
    x_pad = jnp.pad(x_nchw, ((0, 0), (0, 0), (1, 1), (1, 1)))
    taps = [x_pad[:, :, dy:dy + H, dx:dx + W]
            for dy in range(3) for dx in range(3)]          # 9 x (N, Cin, H, W)
    patches = jnp.stack(taps, axis=2).reshape(N, K, M)      # (N, 9*Cin, H*W)

    # Fuse the two heads into one weight matrix / bias vector.
    w_fused = jnp.concatenate(
        [w_loc.reshape(Cl, K), w_conf.reshape(Cc, K)], axis=0)   # (Ct, K)
    b_fused = jnp.concatenate([b_loc, b_conf]).reshape(Ct, 1)    # (Ct, 1)

    loc_f, conf_f = pl.pallas_call(
        _arm_kernel,
        out_shape=(
            jax.ShapeDtypeStruct((N, Cl, M), jnp.float32),
            jax.ShapeDtypeStruct((N, Cc, M), jnp.float32),
        ),
        grid_spec=pltpu.PrefetchScalarGridSpec(
            num_scalar_prefetch=0,
            grid=(N,),
            in_specs=[
                pl.BlockSpec((1, K, M), lambda n: (n, 0, 0)),
                pl.BlockSpec((Ct, K), lambda n: (0, 0)),
                pl.BlockSpec((Ct, 1), lambda n: (0, 0)),
            ],
            out_specs=[
                pl.BlockSpec((1, Cl, M), lambda n: (n, 0, 0)),
                pl.BlockSpec((1, Cc, M), lambda n: (n, 0, 0)),
            ],
        ),
        compiler_params=pltpu.CompilerParams(
            dimension_semantics=("parallel",)),
    )(patches, w_fused, b_fused)

    # (N, Cout, H*W) is NCHW up to a free contiguous reshape (no transpose).
    return loc_f.reshape(N, Cl, H, W), conf_f.reshape(N, Cc, H, W)


def _reference(x_nchw, w_loc, b_loc, w_conf, b_conf):
    dn = lax.conv_dimension_numbers(x_nchw.shape, w_loc.shape,
                                    ("NCHW", "OIHW", "NCHW"))
    loc = lax.conv_general_dilated(x_nchw, w_loc, (1, 1), "SAME",
                                   dimension_numbers=dn)
    loc = loc + b_loc.reshape(1, -1, 1, 1)
    conf = lax.conv_general_dilated(x_nchw, w_conf, (1, 1), "SAME",
                                    dimension_numbers=dn)
    conf = conf + b_conf.reshape(1, -1, 1, 1)
    return loc, conf


if __name__ == "__main__":
    # Small shapes consistent with the module: batch=2, in_channels=4,
    # spatial 16x16, num_anchors=6 -> loc: 24 channels, conf: 12 channels.
    N, Cin, H, W = 2, 4, 16, 16
    num_anchors = 6
    Cl = num_anchors * 4
    Cc = num_anchors * 2

    key = jax.random.PRNGKey(0)
    kx, kwl, kbl, kwc, kbc = jax.random.split(key, 5)

    x = jax.random.normal(kx, (N, Cin, H, W), jnp.float32)
    # Deterministic parameter init (synthetic, not a checkpoint).
    w_loc = 0.1 * jax.random.normal(kwl, (Cl, Cin, 3, 3), jnp.float32)
    b_loc = 0.01 * jax.random.normal(kbl, (Cl,), jnp.float32)
    w_conf = 0.1 * jax.random.normal(kwc, (Cc, Cin, 3, 3), jnp.float32)
    b_conf = 0.01 * jax.random.normal(kbc, (Cc,), jnp.float32)

    loc, conf = anchor_refinement_module(x, w_loc, b_loc, w_conf, b_conf)
    loc = jax.block_until_ready(loc)
    conf = jax.block_until_ready(conf)

    loc_ref, conf_ref = _reference(x, w_loc, b_loc, w_conf, b_conf)
    assert loc.shape == (N, Cl, H, W) and conf.shape == (N, Cc, H, W)
    assert jnp.allclose(loc, loc_ref, atol=1e-4, rtol=1e-4)
    assert jnp.allclose(conf, conf_ref, atol=1e-4, rtol=1e-4)

    print("KERNEL_OK")
</pallas_src>

<mosaic_0001>
module attributes {stable_mosaic.version = 11 : i64} {
  func.func @_arm_kernel(%arg0: i32, %arg1: memref<1x36x256xf32, #tpu.memory_space<vmem>>, %arg2: memref<36x36xf32, #tpu.memory_space<vmem>>, %arg3: memref<36x1xf32, #tpu.memory_space<vmem>>, %arg4: memref<1x24x256xf32, #tpu.memory_space<vmem>>, %arg5: memref<1x12x256xf32, #tpu.memory_space<vmem>>) attributes {dimension_semantics = [#tpu.dimension_semantics<parallel>], iteration_bounds = array<i64: 2>, scalar_prefetch = 0 : i64, scratch_operands = 0 : i64, tpu.core_type = #tpu.core_type<tc>, window_params = [{transform_indices = @transform_0, window_bounds = array<i64: 1, 36, 256>}, {pipeline_mode = #tpu.pipeline_mode<synchronous>, transform_indices = @transform_1, window_bounds = array<i64: 36, 36>}, {pipeline_mode = #tpu.pipeline_mode<synchronous>, transform_indices = @transform_2, window_bounds = array<i64: 36, 1>}, {transform_indices = @transform_3, window_bounds = array<i64: 1, 24, 256>}, {transform_indices = @transform_4, window_bounds = array<i64: 1, 12, 256>}]} {
    %c0 = arith.constant 0 : index
    %c0_0 = arith.constant 0 : index
    %0 = vector.load %arg2[%c0, %c0_0] : memref<36x36xf32, #tpu.memory_space<vmem>>, vector<36x36xf32>
    %c0_1 = arith.constant 0 : index
    %c0_2 = arith.constant 0 : index
    %c0_3 = arith.constant 0 : index
    %1 = vector.load %arg1[%c0_1, %c0_2, %c0_3] : memref<1x36x256xf32, #tpu.memory_space<vmem>>, vector<1x36x256xf32>
    %2 = vector.shape_cast %1 : vector<1x36x256xf32> to vector<36x256xf32>
    %cst = arith.constant dense<0.000000e+00> : vector<36x256xf32>
    %3 = tpu.matmul %0, %2, %cst {dimension_numbers = #tpu.dot_dimension_numbers<[1], [0], [0], [1], [0, 0, 1, 1], [], []>} : vector<36x36xf32>, vector<36x256xf32>, vector<36x256xf32> -> vector<36x256xf32>
    %c0_4 = arith.constant 0 : index
    %c0_5 = arith.constant 0 : index
    %4 = vector.load %arg3[%c0_4, %c0_5] : memref<36x1xf32, #tpu.memory_space<vmem>>, vector<36x1xf32>
    %5 = vector.broadcast %4 : vector<36x1xf32> to vector<36x256xf32>
    %6 = arith.addf %3, %5 : vector<36x256xf32>
    %7 = vector.extract_strided_slice %6 {offsets = [0, 0], sizes = [24, 256], strides = [1, 1]} : vector<36x256xf32> to vector<24x256xf32>
    %c0_6 = arith.constant 0 : index
    %c0_7 = arith.constant 0 : index
    %c0_8 = arith.constant 0 : index
    %8 = vector.load %arg4[%c0_6, %c0_7, %c0_8] : memref<1x24x256xf32, #tpu.memory_space<vmem>>, vector<1x24x256xf32>
    %9 = vector.shape_cast %8 : vector<1x24x256xf32> to vector<24x256xf32>
    %10 = vector.shape_cast %7 : vector<24x256xf32> to vector<1x24x256xf32>
    tpu.vector_store %arg4[%c0_6, %c0_7, %c0_8], %10 {strides = array<i32>} : memref<1x24x256xf32, #tpu.memory_space<vmem>>, vector<1x24x256xf32>,
    %11 = vector.extract_strided_slice %6 {offsets = [24, 0], sizes = [12, 256], strides = [1, 1]} : vector<36x256xf32> to vector<12x256xf32>
    %c0_9 = arith.constant 0 : index
    %c0_10 = arith.constant 0 : index
    %c0_11 = arith.constant 0 : index
    %12 = vector.load %arg5[%c0_9, %c0_10, %c0_11] : memref<1x12x256xf32, #tpu.memory_space<vmem>>, vector<1x12x256xf32>
    %13 = vector.shape_cast %12 : vector<1x12x256xf32> to vector<12x256xf32>
    %14 = vector.shape_cast %11 : vector<12x256xf32> to vector<1x12x256xf32>
    tpu.vector_store %arg5[%c0_9, %c0_10, %c0_11], %14 {strides = array<i32>} : memref<1x12x256xf32, #tpu.memory_space<vmem>>, vector<1x12x256xf32>,
    return
  }
  func.func @transform_0(%arg0: i32) -> (i32, i32, i32) {
    %c0_i32 = arith.constant 0 : i32
    %c0_i32_0 = arith.constant 0 : i32
    %c0_i32_1 = arith.constant 0 : i32
    return %arg0, %c0_i32, %c0_i32_0 : i32, i32, i32
  }
  func.func @transform_1(%arg0: i32) -> (i32, i32) {
    %c0_i32 = arith.constant 0 : i32
    %c0_i32_0 = arith.constant 0 : i32
    %c0_i32_1 = arith.constant 0 : i32
    return %c0_i32, %c0_i32_0 : i32, i32
  }
  func.func @transform_2(%arg0: i32) -> (i32, i32) {
    %c0_i32 = arith.constant 0 : i32
    %c0_i32_0 = arith.constant 0 : i32
    %c0_i32_1 = arith.constant 0 : i32
    return %c0_i32, %c0_i32_0 : i32, i32
  }
  func.func @transform_3(%arg0: i32) -> (i32, i32, i32) {
    %c0_i32 = arith.constant 0 : i32
    %c0_i32_0 = arith.constant 0 : i32
    %c0_i32_1 = arith.constant 0 : i32
    return %arg0, %c0_i32, %c0_i32_0 : i32, i32, i32
  }
  func.func @transform_4(%arg0: i32) -> (i32, i32, i32) {
    %c0_i32 = arith.constant 0 : i32
    %c0_i32_0 = arith.constant 0 : i32
    %c0_i32_1 = arith.constant 0 : i32
    return %arg0, %c0_i32, %c0_i32_0 : i32, i32, i32
  }
}

</mosaic_0001>

<bundles_post_ra>
// kernel: anchor_refinement_module.1
= control target key start
LH: loop header
LB: loop body
LE: loop exit
PB: predicated region body
PF: predicated region fallthrough
CT: control target
= control target key end

     0   :  { %s523_s15 = smov 0   ;;  %s596_s0 = inlined_call_operand.vmem [shape: f32[2,36,256], index: 0, kind: input, shape index: {}]   ;;  %s597_s1 = inlined_call_operand.vmem [shape: f32[36,36], index: 1, kind: input, shape index: {}]   ;;  %s598_s2 = inlined_call_operand.vmem [shape: f32[36,1], index: 2, kind: input, shape index: {}]   ;;  %s599_s3 = inlined_call_operand.vmem [shape: f32[2,24,256], index: 3, kind: output, shape index: {0}]   ;;  %s600_s4 = inlined_call_operand.vmem [shape: f32[2,12,256], index: 4, kind: output, shape index: {1}]  }
   0x1 LB: > { %s441_s16 = sadd.s32 4294967295, %s495_s15   ;;  %p445_p0 = scmp.ge.s32.totalorder %s495_s15, 1  ;;  %s495_s15 = sphi %s523_s15, %s15_s15  }
   0x2   : > { %p165_p1 = scmp.lt.s32.totalorder %s495_s15, 3 }
   0x4   : > { %p166_p2 = pnand %p445_p0, %p165_p1 }
   0x5   : > { %p196_p3 = scmp.lt.s32.totalorder (!%p166_p2), %s441_s16, 1 }
   0x6   : > { %169 = sbr.rel (%p166_p2) target bundleno = 173 (0xad), region = 32 }
   0xb   : > { %v228_v0 = vld [vmem:[%s598_s2 + $0x10] sm:$0xff]  ;;  %v226_v1 = vld [vmem:[%s598_s2] sm:$0xff]  ;;  %s602_s16 = smov (!%p196_p3, %s441_s16), 1  ;;  %v497_v2 = vmov 0   ;;  %vm272_vm0 = vcmask 1043456   ;;  %vm256_vm1 = vcmask 293888  }
   0xc   : > { %487 = vset.pattern.permute.xlu1 %v497_v2  ;;  %486 = vset.pattern.permute.xlu0 %v497_v2  ;;  %v230_v3 = vld [vmem:[%s598_s2 + $0x20] sm:$0xf]  ;;  %s475_s23 = smul.u32 80, %s602_s16  ;;  %v214_v15 = vld [vmem:[%s597_s1 + $0x18] sm:$0xff]  ;;  %v227_v17 = vld [vmem:[%s598_s2 + $0x8] sm:$0xff]  ;;  %s464_s21 = sshll.u32 %s602_s16, 5 }
   0xd   : > { %243 = vperm.xlu1 %487, %v228_v0   ;;  %233 = vperm.xlu0 %486, %v226_v1   ;;  %v211_v14 = vld [vmem:[%s597_s1] sm:$0xff]  ;;  %v229_v16 = vld [vmem:[%s598_s2 + $0x18] sm:$0xff]  ;;  %v212_v18 = vld [vmem:[%s597_s1 + $0x8] sm:$0xff]  ;;  %s476_s17 = smul.u32 48, %s602_s16  ;;  %s210_s24 = scalar_lea.vmem %s600_s4, %s464_s21 }
   0xe   : > { %488 = vset.pattern.permute.xlu2 %v497_v2  ;;  %s200_s26 = scalar_lea.vmem %s596_s0, %s475_s23  ;;  %v215_v19 = vld [vmem:[%s597_s1 + $0x20] sm:$0xf]  ;;  %v213_v20 = vld [vmem:[%s597_s1 + $0x10] sm:$0xff] }
   0xf   : > { %253 = vperm.xlu2 %488, %v230_v3   ;;  %v224_v4 = vld [vmem:[%s200_s26 + $0x40] sm:$0xf]  ;;  %v225_v5 = vld [vmem:[%s200_s26 + $0x48] sm:$0xf]  ;;  %v222_v6 = vld [vmem:[%s200_s26 + $0x30] sm:$0xff]  ;;  %s581_s20 = scalar_lea.vmem %s599_s3, %s476_s17 }
  0x10   : > { %450 = vmatpush.msk.msra.mxu0 %vm272_vm0, %v224_v4  ;;  %456 = vmatpush.msk.msra.mxu1 %vm272_vm0, %v225_v5  ;;  %v223_v7 = vld [vmem:[%s200_s26 + $0x38] sm:$0xff]  ;;  %v220_v8 = vld [vmem:[%s200_s26 + $0x20] sm:$0xff]  ;;  %v221_v9 = vld [vmem:[%s200_s26 + $0x28] sm:$0xff] }
  0x11   : > { %465 = vmatpush.msk.msra.mxu2 %vm272_vm0, %v224_v4  ;;  %470 = vmatpush.msk.msra.mxu3 %vm272_vm0, %v225_v5  ;;  %v218_v10 = vld [vmem:[%s200_s26 + $0x10] sm:$0xff]  ;;  %v219_v11 = vld [vmem:[%s200_s26 + $0x18] sm:$0xff]  ;;  %v216_v12 = vld [vmem:[%s200_s26] sm:$0xff] }
  0x12   : > { %291 = vmatpush.msra.mxu0 %v222_v6  ;;  %323 = vmatpush.msra.mxu1 %v223_v7  ;;  %v217_v13 = vld [vmem:[%s200_s26 + $0x8] sm:$0xff] }
  0x13   : > { %466 = vmatpush.msra.mxu2 %v222_v6  ;;  %471 = vmatpush.msra.mxu3 %v223_v7 }
  0x14   : > { %292 = vmatpush.msra.mxu0 %v220_v8  ;;  %324 = vmatpush.msra.mxu1 %v221_v9 }
  0x15   : > { %467 = vmatpush.msra.mxu2 %v220_v8  ;;  %472 = vmatpush.msra.mxu3 %v221_v9 }
  0x16   : > { %293 = vmatpush.msra.mxu0 %v218_v10  ;;  %325 = vmatpush.msra.mxu1 %v219_v11 }
  0x17   : > { %468 = vmatpush.msra.mxu2 %v218_v10  ;;  %473 = vmatpush.msra.mxu3 %v219_v11 }
  0x18   : > { %294 = vmatpush.msra.mxu0 %v216_v12  ;;  %326 = vmatpush.msra.mxu1 %v217_v13 }
  0x19   : > { %451 = vmatmul.msk.f32.vlgmr.msra.gmra.mxu0 %vm256_vm1, %v211_v14  ;;  %457 = vmatmul.msk.f32.vlgmr.msra.gmra.mxu1 %vm256_vm1, %v211_v14 }
  0x1a   : > { %469 = vmatpush.msra.mxu2 %v216_v12  ;;  %474 = vmatpush.msra.mxu3 %v217_v13 }
  0x1b   : > { %454 = vmatmul.msk.f32.vlgmr.msra.gmra.mxu2 %vm256_vm1, %v214_v15  ;;  %460 = vmatmul.msk.f32.vlgmr.msra.gmra.mxu3 %vm256_vm1, %v214_v15 }
  0x1c   : > { %248 = vperm.xlu1 %487, %v229_v16   ;;  %238 = vperm.xlu0 %486, %v227_v17  }
  0x21   : > { %452 = vmatmul.msk.f32.gmra.mxu0 %vm256_vm1, %v212_v18  ;;  %458 = vmatmul.msk.f32.gmra.mxu1 %vm256_vm1, %v212_v18 }
  0x23   : > { %455 = vmatmul.msk.f32.gmra.mxu2 %vm256_vm1, %v215_v19  ;;  %461 = vmatmul.msk.f32.gmra.mxu3 %vm256_vm1, %v215_v19 }
  0x29   : > { %453 = vmatmul.msk.f32.gmra.mxu0 %vm256_vm1, %v213_v20  ;;  %459 = vmatmul.msk.f32.gmra.mxu1 %vm256_vm1, %v213_v20 }
  0x69   : > { %v254_v37 = vpop.permute.xlu2 %253 }
  0x7f   : > { %v244_v21 = vpop.permute.xlu1 %243  ;;  %v234_v22 = vpop.permute.xlu0 %233 }
  0x8e   : > { %v249_v27 = vpop.permute.xlu1 %248  ;;  %v239_v28 = vpop.permute.xlu0 %238 }
  0x96   : > { %v296_v23 = vpop.f32.mrf.mxu0  ;;  %v328_v24 = vpop.f32.mrf.mxu1 }
  0x97   : > { %v297_v25 = vadd.f32 %v296_v23, %v234_v22  ;;  %v329_v26 = vadd.f32 %v328_v24, %v234_v22 }
  0x99   : > { %343 = vst [vmem:[%s581_s20] sm:$0xff] %v297_v25 }
  0x9a   : > { %344 = vst [vmem:[%s581_s20 + $0x8] sm:$0xff] %v329_v26 }
  0x9e   : > { %v299_v29 = vpop.f32.mrf.mxu0  ;;  %v305_v30 = vpop.f32.mrf.mxu2 }
  0x9f   : > { %v300_v31 = vadd.f32 %v299_v29, %v239_v28  ;;  %v306_v32 = vadd.f32 %v305_v30, %v249_v27  ;;  %v331_v33 = vpop.f32.mrf.mxu1  ;;  %v337_v34 = vpop.f32.mrf.mxu3 }
  0xa0   : > { %v332_v35 = vadd.f32 %v331_v33, %v239_v28  ;;  %v338_v36 = vadd.f32 %v337_v34, %v249_v27 }
  0xa1   : > { %345 = vst [vmem:[%s581_s20 + $0x10] sm:$0xff] %v300_v31 }
  0xa2   : > { %349 = vst [vmem:[%s210_s24] sm:$0xff] %v306_v32 }
  0xa3   : > { %346 = vst [vmem:[%s581_s20 + $0x18] sm:$0xff] %v332_v35 }
  0xa4   : > { %350 = vst [vmem:[%s210_s24 + $0x8] sm:$0xff] %v338_v36 }
  0xa6   : > { %v302_v38 = vpop.f32.mrf.mxu0  ;;  %v308_v39 = vpop.f32.mrf.mxu2 }
  0xa7   : > { %v303_v40 = vadd.f32 %v302_v38, %v244_v21  ;;  %v309_v41 = vadd.f32 %v308_v39, %v254_v37  ;;  %v334_v42 = vpop.f32.mrf.mxu1  ;;  %v340_v43 = vpop.f32.mrf.mxu3 }
  0xa8   : > { %v335_v44 = vadd.f32 %v334_v42, %v244_v21  ;;  %v341_v45 = vadd.f32 %v340_v43, %v254_v37 }
  0xa9   : > { %347 = vst [vmem:[%s581_s20 + $0x20] sm:$0xff] %v303_v40 }
  0xaa   : > { %351 = vst [vmem:[%s210_s24 + $0x10] sm:$0xf] %v309_v41 }
  0xab   : > { %348 = vst [vmem:[%s581_s20 + $0x28] sm:$0xff] %v335_v44 }
  0xac   : > { %352 = vst [vmem:[%s210_s24 + $0x18] sm:$0xf] %v341_v45 }
  0xad PF: > { %s15_s15 = sadd.s32 1, %s495_s15  }
  0xae   : > { %p12_p4 = scmp.ge.s32.totalorder %s15_s15, 4  }
  0xb0   :  { %14 = sbr.rel (!%p12_p4) target bundleno = 1 (0x1), region = 74 }

</bundles_post_ra>
